<compile_context>
chip_gen: v7x
topology: tpu7x:2x2x1
jax: 0.10.0
libtpu: 0.0.40
codegen_flags: <defaults>
</compile_context>

<pallas_src>
import jax
import jax.numpy as jnp
from jax import lax
from jax.experimental import pallas as pl
from jax.experimental.pallas import tpu as pltpu


_SIGMA_MIN = 1e-6
_SIGMA_MAX = 1e6
_INV_SQRT2 = 0.7071067811865476

_LANES = 128            # one vreg lane width: unmasked stores, contiguous DMA,
                        # minimal probability of needing a wrapper-side pad
_MAX_ROW_TILE = 8192    # (8192, 128) f32 block = 4 MiB per buffer
_MIN_GRID_STEPS = 4     # target >= 4 grid steps (pipeline overlap + megacore)
_VMEM_LIMIT = 48 << 20  # 3 arrays x 2 buffers x 4 MiB = 24 MiB + headroom
                        # (v5e's default scoped VMEM is only 16 MiB)


# ------------------------------- kernels ------------------------------------

def _inv_scaled_sigma(sigma_ref):
    sigma = jnp.clip(sigma_ref[...].astype(jnp.float32), _SIGMA_MIN, _SIGMA_MAX)
    # Exact reciprocal (see header note on approx=True) shared by both erf
    # evaluations in the fused kernels.
    return pl.reciprocal(sigma, approx=False) * jnp.float32(_INV_SQRT2)


def _gaussian_cdf_kernel(x_ref, sigma_ref, out_ref):
    # Normal(0, sigma).cdf(x) = 0.5 * (1 + erf(x / (sigma * sqrt(2))))
    x = x_ref[...].astype(jnp.float32)
    inv = _inv_scaled_sigma(sigma_ref)
    out_ref[...] = (0.5 * (1.0 + lax.erf(x * inv))).astype(out_ref.dtype)


def _gaussian_likelihood_kernel(x_ref, sigma_ref, out_ref):
    # Fused likelihood: cdf(x + 0.5) - cdf(x - 0.5) + 1e-6 in one HBM pass.
    x = x_ref[...].astype(jnp.float32)
    inv = _inv_scaled_sigma(sigma_ref)
    hi = lax.erf((x + 0.5) * inv)
    lo = lax.erf((x - 0.5) * inv)
    out_ref[...] = (0.5 * (hi - lo) + 1e-6).astype(out_ref.dtype)


def _gaussian_rate_kernel(x_ref, sigma_ref, out_ref):
    # Fused rate term: -log2(likelihood).  Saves the downstream read+write
    # pass over the likelihood tensor; log2 goes to the idle EUP slot.
    x = x_ref[...].astype(jnp.float32)
    inv = _inv_scaled_sigma(sigma_ref)
    hi = lax.erf((x + 0.5) * inv)
    lo = lax.erf((x - 0.5) * inv)
    lik = 0.5 * (hi - lo) + 1e-6
    out_ref[...] = (-jnp.log2(lik)).astype(out_ref.dtype)


# ------------------------------- wrapper -------------------------------------

def _round_up(v, m):
    return -(-v // m) * m


def _pick_row_tile(rows):
    """Row tile: multiple of 8, <= 4 MiB block, and >= 2 grid steps when
    rows >= 16 so the pipeline (and v7x's second core) is never idle."""
    if rows < 16:
        return rows  # tiny input: single full-extent block (legal any size)
    tile = _round_up(pl.cdiv(rows, _MIN_GRID_STEPS), 8)
    return min(_MAX_ROW_TILE, max(tile, 8))


def _run_elementwise(kernel_fn, input_, sigma):
    assert input_.shape[0:3] == sigma.shape[0:3], (
        "Shape dismatch between y and gaussian sigma")
    if sigma.shape != input_.shape:
        # Reference module only requires shape[0:3] to match.
        # TODO(synk): stream broadcast sigma via a size-1 block dim instead of
        # materializing the full tensor (saves up to ~2x input HBM traffic).
        sigma = jnp.broadcast_to(sigma, input_.shape)

    orig_shape = input_.shape
    out_dtype = input_.dtype

    x_flat = input_.reshape(-1)
    s_flat = sigma.reshape(-1)
    n = x_flat.shape[0]

    # Pad only when numel is not a multiple of the 128-lane width (rare for
    # NCHW latents); the pad is a wrapper-side copy, so keep it improbable.
    pad = (-n) % _LANES
    if pad:
        x_flat = jnp.pad(x_flat, (0, pad))
        s_flat = jnp.pad(s_flat, (0, pad), constant_values=1.0)

    rows = (n + pad) // _LANES
    x2d = x_flat.reshape(rows, _LANES)
    s2d = s_flat.reshape(rows, _LANES)

    row_tile = _pick_row_tile(rows)
    grid = (pl.cdiv(rows, row_tile),)

    spec = pl.BlockSpec((row_tile, _LANES), lambda i: (i, 0))
    out2d = pl.pallas_call(
        kernel_fn,
        out_shape=jax.ShapeDtypeStruct((rows, _LANES), out_dtype),
        grid_spec=pltpu.PrefetchScalarGridSpec(
            num_scalar_prefetch=0,
            grid=grid,
            in_specs=[spec, spec],
            out_specs=spec,
        ),
        compiler_params=pltpu.CompilerParams(
            dimension_semantics=("parallel",),
            vmem_limit_bytes=_VMEM_LIMIT,
        ),
    )(x2d, s2d)

    out_flat = out2d.reshape(-1)
    if pad:
        out_flat = out_flat[:n]
    return out_flat.reshape(orig_shape)


def entropy_model_gaussian_forward(input_, sigma):
    """Matches EntropyModelGaussion.forward(input_, sigma)."""
    return _run_elementwise(_gaussian_cdf_kernel, input_, sigma)


def entropy_model_gaussian_likelihood(input_, sigma):
    """Matches EntropyModelGaussion.likelihood(input_, sigma), fused."""
    return _run_elementwise(_gaussian_likelihood_kernel, input_, sigma)


def entropy_model_gaussian_rate(input_, sigma):
    """Fused -log2(likelihood(input_, sigma)) rate term (single HBM pass)."""
    return _run_elementwise(_gaussian_rate_kernel, input_, sigma)


# -------------------- pure-JAX references for validation --------------------

def _ref_forward(x, sigma):
    sigma = jnp.clip(sigma.astype(jnp.float32), _SIGMA_MIN, _SIGMA_MAX)
    return 0.5 * (1.0 + lax.erf(x.astype(jnp.float32) / (sigma * jnp.sqrt(2.0))))


def _ref_likelihood(x, sigma):
    return _ref_forward(x + 0.5, sigma) - _ref_forward(x - 0.5, sigma) + 1e-6


if __name__ == "__main__":
    key = jax.random.PRNGKey(0)
    k1, k2, k3, k4 = jax.random.split(key, 4)

    # Shapes consistent with an NCHW latent tensor (module has no params).
    B, C, H, W = 2, 4, 16, 16
    x = jax.random.normal(k1, (B, C, H, W), dtype=jnp.float32) * 2.0
    sigma = jnp.abs(jax.random.normal(k2, (B, C, H, W), dtype=jnp.float32)) + 0.1

    # forward (CDF)
    cumul = jax.block_until_ready(entropy_model_gaussian_forward(x, sigma))
    assert cumul.shape == x.shape and cumul.dtype == x.dtype
    assert jnp.max(jnp.abs(cumul - _ref_forward(x, sigma))) < 1e-5, (
        "forward mismatch vs reference CDF")

    # fused likelihood
    lik = jax.block_until_ready(entropy_model_gaussian_likelihood(x, sigma))
    assert lik.shape == x.shape
    assert jnp.max(jnp.abs(lik - _ref_likelihood(x, sigma))) < 1e-5, (
        "likelihood mismatch vs reference")

    # fused rate: validate by mapping back to likelihood space (avoids the
    # huge -log2 amplification of f32 rounding near likelihood == 1e-6).
    rate = jax.block_until_ready(entropy_model_gaussian_rate(x, sigma))
    assert rate.shape == x.shape
    assert jnp.max(jnp.abs(jnp.exp2(-rate.astype(jnp.float32))
                           - _ref_likelihood(x, sigma))) < 1e-5, (
        "rate mismatch vs reference")

    # broadcast sigma (reference module only requires shape[0:3] to match)
    sigma_b = jnp.abs(jax.random.normal(k3, (B, C, H, 1), dtype=jnp.float32)) + 0.2
    cb = jax.block_until_ready(entropy_model_gaussian_forward(x, sigma_b))
    assert cb.shape == x.shape
    assert jnp.max(jnp.abs(cb - _ref_forward(x, sigma_b))) < 1e-5, (
        "forward mismatch with broadcast sigma")

    # odd-sized input exercises the (rare) lane-pad path
    x2 = jax.random.normal(k3, (2, 5, 7, 9), dtype=jnp.float32)
    s2 = jnp.abs(jax.random.normal(k4, (2, 5, 7, 9), dtype=jnp.float32)) + 0.2
    c2 = jax.block_until_ready(entropy_model_gaussian_forward(x2, s2))
    assert c2.shape == x2.shape
    assert jnp.max(jnp.abs(c2 - _ref_forward(x2, s2))) < 1e-5, (
        "forward mismatch on odd-sized input")

    # bf16 I/O path (memory-bound generations): upcast happens in-kernel.
    xb = x.astype(jnp.bfloat16)
    sb = sigma.astype(jnp.bfloat16)
    cbf = jax.block_until_ready(entropy_model_gaussian_forward(xb, sb))
    assert cbf.dtype == jnp.bfloat16 and cbf.shape == x.shape
    assert jnp.max(jnp.abs(cbf.astype(jnp.float32) - _ref_forward(xb, sb))) < 1e-2, (
        "forward mismatch in bf16 I/O mode")

    print("KERNEL_OK")
</pallas_src>

<mosaic_0001>
module attributes {stable_mosaic.version = 11 : i64} {
  func.func @_gaussian_cdf_kernel(%arg0: i32, %arg1: memref<8x128xf32, #tpu.memory_space<vmem>>, %arg2: memref<8x128xf32, #tpu.memory_space<vmem>>, %arg3: memref<8x128xf32, #tpu.memory_space<vmem>>) attributes {dimension_semantics = [#tpu.dimension_semantics<parallel>], iteration_bounds = array<i64: 2>, scalar_prefetch = 0 : i64, scratch_operands = 0 : i64, tpu.core_type = #tpu.core_type<tc>, window_params = [{transform_indices = @transform_0, window_bounds = array<i64: 8, 128>}, {transform_indices = @transform_1, window_bounds = array<i64: 8, 128>}, {transform_indices = @transform_2, window_bounds = array<i64: 8, 128>}]} {
    %c0 = arith.constant 0 : index
    %c0_0 = arith.constant 0 : index
    %0 = vector.load %arg1[%c0, %c0_0] : memref<8x128xf32, #tpu.memory_space<vmem>>, vector<8x128xf32>
    %c0_1 = arith.constant 0 : index
    %c0_2 = arith.constant 0 : index
    %1 = vector.load %arg2[%c0_1, %c0_2] : memref<8x128xf32, #tpu.memory_space<vmem>>, vector<8x128xf32>
    %cst = arith.constant 9.99999997E-7 : f32
    %cst_3 = arith.constant 1.000000e+06 : f32
    %2 = vector.broadcast %cst : f32 to vector<8x128xf32>
    %3 = arith.maximumf %2, %1 : vector<8x128xf32>
    %4 = vector.broadcast %cst_3 : f32 to vector<8x128xf32>
    %5 = arith.minimumf %4, %3 : vector<8x128xf32>
    %6 = tpu.reciprocal %5 : vector<8x128xf32> -> vector<8x128xf32>
    %cst_4 = arith.constant 0.707106769 : f32
    %7 = vector.broadcast %cst_4 : f32 to vector<8x128xf32>
    %8 = arith.mulf %6, %7 : vector<8x128xf32>
    %9 = arith.mulf %0, %8 : vector<8x128xf32>
    %10 = math.erf %9 : vector<8x128xf32>
    %cst_5 = arith.constant 1.000000e+00 : f32
    %11 = vector.broadcast %cst_5 : f32 to vector<8x128xf32>
    %12 = arith.addf %11, %10 : vector<8x128xf32>
    %cst_6 = arith.constant 5.000000e-01 : f32
    %13 = vector.broadcast %cst_6 : f32 to vector<8x128xf32>
    %14 = arith.mulf %13, %12 : vector<8x128xf32>
    %c0_7 = arith.constant 0 : index
    %c0_8 = arith.constant 0 : index
    %15 = vector.load %arg3[%c0_7, %c0_8] : memref<8x128xf32, #tpu.memory_space<vmem>>, vector<8x128xf32>
    tpu.vector_store %arg3[%c0_7, %c0_8], %14 {strides = array<i32>} : memref<8x128xf32, #tpu.memory_space<vmem>>, vector<8x128xf32>,
    return
  }
  func.func @transform_0(%arg0: i32) -> (i32, i32) {
    %c0_i32 = arith.constant 0 : i32
    %c0_i32_0 = arith.constant 0 : i32
    return %arg0, %c0_i32 : i32, i32
  }
  func.func @transform_1(%arg0: i32) -> (i32, i32) {
    %c0_i32 = arith.constant 0 : i32
    %c0_i32_0 = arith.constant 0 : i32
    return %arg0, %c0_i32 : i32, i32
  }
  func.func @transform_2(%arg0: i32) -> (i32, i32) {
    %c0_i32 = arith.constant 0 : i32
    %c0_i32_0 = arith.constant 0 : i32
    return %arg0, %c0_i32 : i32, i32
  }
}

</mosaic_0001>

<bundles_post_ra>
// kernel: tpu_custom_call.1
= control target key start
LH: loop header
LB: loop body
LE: loop exit
PB: predicated region body
PF: predicated region fallthrough
CT: control target
= control target key end

     0   :  { %7 = vsyncpa [#allocation3], 0  ;;  %s743_s0 = inlined_call_operand.hbm [shape: f32[16,128], index: 0, kind: input, shape index: {}]   ;;  %s744_s1 = inlined_call_operand.hbm [shape: f32[16,128], index: 1, kind: input, shape index: {}]   ;;  %s745_s2 = inlined_call_operand.hbm [shape: f32[16,128], index: 2, kind: output, shape index: {}]  }
   0x1   :  { %9 = vsyncpa [#allocation3 + $0x1], 0 }
   0x2   :  { %10 = vsyncpa [#allocation6], 0 }
   0x3   :  { %12 = vsyncpa [#allocation6 + $0x1], 0 }
   0x4   :  { %13 = vsyncpa [#allocation4], 0 }
   0x5   :  { %15 = vsyncpa [#allocation4 + $0x1], 0  ;;  %s534_s9 = smov 0   ;;  %s536_s10 = smov 0  }
   0x6   :  { %s538_s11 = smov 0   ;;  %s540_s12 = smov 0  }
   0x7 LB: > { %s555_s13 = sadd.s32 4294967295, %s514_s12   ;;  %s314_s14 = sadd.s32 4294967294, %s514_s12   ;;  %s514_s12 = sphi %s540_s12, %s764_s12   ;;  %s510_s11 = sphi %s538_s11, %s763_s11   ;;  %s506_s10 = sphi %s536_s10, %s762_s10   ;;  %s502_s9 = sphi %s534_s9, %s761_s9  }
   0x8   : > { %s559_s15 = sadd.s32 1, %s514_s12   ;;  %s28_s16 = sadd.s32 1, %s510_s11 }
   0x9   : > { %s25_s17 = ssub.s32 %s514_s12, %s559_s15  ;;  %p35_p0 = scmp.ne.s32.totalorder %s510_s11, %s506_s10 }
   0xa   : > { %p26_p1 = scmp.eq.s32.totalorder %s25_s17, 0  ;;  %p36_p2 = scmp.eq.s32.totalorder %s514_s12, 0 }
   0xb   : > { %p41_p3 = scmp.ne.s32.totalorder %s506_s10, %s502_s9  ;;  %p42_p4 = scmp.eq.s32.totalorder %s555_s13, 0 }
   0xc   : > { %s571_s18 = scalar_select %p26_p1, %s510_s11, %s28_s16  }
   0xd   : > { %p573_p5 = por %p36_p2, %p35_p0  ;;  %p577_p6 = por %p42_p4, %p41_p3 }
   0xe   : > { %p91_p7 = scmp.eq.s32.totalorder %s555_s13, 1  ;;  %p97_p8 = scmp.eq.s32.totalorder %s314_s14, 1 }
   0xf   : > { %s749_s20 = scalar_select %p577_p6, 1, 0 }
  0x10   : > { %p346_p10 = scmp.lt.s32.totalorder %s514_s12, 2  ;;  %p584_p11 = por %p91_p7, %p35_p0 }
  0x11   : > { %p588_p12 = por %p97_p8, %p41_p3  ;;  %s593_s23 = sand.u32 1, %s510_s11  }
  0x12   : > { %s750_s21 = scalar_select %p584_p11, 1, 0 }
  0x13   : > { %s751_s22 = scalar_select %p588_p12, 1, 0 }
  0x14   : > { %s318_s24 = sshll.u32 %s514_s12, 7  ;;  %s317_s25 = sshll.u32 %s593_s23, 3 }
  0x15   : > { %s602_s28 = scalar_lea.hbm %s743_s0, %s318_s24  ;;  %s121_s29 = scalar_lea.vmem [#allocation2], %s317_s25 }
  0x16   : > { %s128_s30 = sshll.u32 %s121_s29, 4  ;;  %p608_p13 = pnand %p346_p10, %p573_p5  ;;  %s612_s30 = int_to_ptr.vmem [resolvable:$true] %s128_s30 }
  0x17   : > { %s118_s4 = scalar_lea.sflag [#allocation3], %s593_s23  ;;  %s384_s5 = scalar_lea.hbm %s602_s28, 128 }
  0x18   : > { %p385_p2 = scmp.ne.s32.totalorder %s602_s28, %s384_s5  ;;  %p386_p3 = pneg %p608_p13 }
  0x19   : > { %s389_s8 = scalar_lea.hbm %s743_s0, 256  ;;  %p390_p5 = scmp.lt.u32.totalorder %s602_s28, %s743_s0 }
  0x1a   : > { %p387_p4 = pnand %p386_p3, %p385_p2  ;;  %p391_p8 = scmp.lt.u32.totalorder %s389_s8, %s384_s5 }
  0x1b   : > { %p393_p9 = scmp.lt.u32.totalorder %s384_s5, %s602_s28 }
  0x1c   : > { %p388_p7 = pneg %p387_p4  ;;  %p392_p10 = por %p391_p8, %p390_p5 }
  0x1e   : > { %p394_p0 = por %p393_p9, %p392_p10 }
  0x20   : > { %p395_p1 = pnand %p394_p0, %p388_p7 }
  0x22   : > { %398 = shalt.err (!%p395_p1)
}
  0x23   : > { %s399_s17 = scalar_lea.vmem %s612_s30, 128  ;;  %s516_s19 = smov [#allocation2]  }
  0x24   : > { %p400_p2 = scmp.ne.s32.totalorder %s612_s30, %s399_s17  ;;  %s404_s26 = sshll.u32 %s516_s19, 4  ;;  %s405_s26 = int_to_ptr.vmem [resolvable:$false] %s404_s26 }
  0x25   : > { %s406_s27 = scalar_lea.vmem %s405_s26, 256  ;;  %p407_p11 = scmp.lt.s32.totalorder %s612_s30, %s405_s26 }
  0x26   : > { %p402_p4 = pnand %p400_p2, %p386_p3  ;;  %p408_p5 = scmp.lt.s32.totalorder %s406_s27, %s399_s17 }
  0x28   : > { %p403_p12 = pneg %p402_p4  ;;  %p409_p8 = por %p408_p5, %p407_p11 }
  0x2a   : > { %p410_p9 = pnand %p409_p8, %p403_p12 }
  0x2c   : > { %413 = shalt.err (!%p410_p9)
}
  0x2d   : > { %338 = dma.hbm_to_vmem [thread:$0]  (!%p608_p13), %s602_s28, 128, %s612_s30, %s118_s4  }
  0x2e   : > { %p753_p0 = scmp.lt.s32.totalorder %s514_s12, 3  ;;  %p754_p1 = scmp.ge.s32.totalorder %s514_s12, 1 }
  0x2f   : > { %s655_s7 = scalar_lea.hbm %s744_s1, %s318_s24  ;;  %s139_s8 = scalar_lea.vmem [#allocation5], %s317_s25 }
  0x30   : > { %p646_p7 = pnand %p754_p1, %p753_p0  ;;  %s146_s14 = sshll.u32 %s139_s8, 4  ;;  %s147_s14 = int_to_ptr.vmem [resolvable:$true] %s146_s14 }
  0x31   : > { %s136_s28 = scalar_lea.sflag [#allocation6], %s593_s23  ;;  %s414_s30 = scalar_lea.hbm %s655_s7, 128 }
  0x32   : > { %s755_s29 = scalar_select %p646_p7, 1, 0 }
  0x33   : > { %p415_p11 = scmp.ne.s32.totalorder %s655_s7, %s414_s30  ;;  %s419_s24 = scalar_lea.hbm %s744_s1, 256 }
  0x34   : > { %p420_p2 = scmp.lt.u32.totalorder %s655_s7, %s744_s1  ;;  %p421_p4 = scmp.lt.u32.totalorder %s419_s24, %s414_s30 }
  0x35   : > { %p417_p12 = pnand %p415_p11, %p386_p3  ;;  %p423_p8 = scmp.lt.u32.totalorder %s414_s30, %s655_s7 }
  0x36   : > { %p422_p5 = por %p421_p4, %p420_p2 }
  0x37   : > { %p418_p10 = pneg %p417_p12 }
  0x38   : > { %p424_p9 = por %p423_p8, %p422_p5 }
  0x3a   : > { %p425_p0 = pnand %p424_p9, %p418_p10 }
  0x3c   : > { %428 = shalt.err (!%p425_p0)
}
  0x3d   : > { %s429_s23 = scalar_lea.vmem %s147_s14, 128  ;;  %s517_s25 = smov [#allocation5]  }
  0x3e   : > { %p430_p1 = scmp.ne.s32.totalorder %s147_s14, %s429_s23  ;;  %s434_s26 = sshll.u32 %s517_s25, 4  ;;  %s435_s26 = int_to_ptr.vmem [resolvable:$false] %s434_s26 }
  0x3f   : > { %s436_s27 = scalar_lea.vmem %s435_s26, 256  ;;  %p437_p6 = scmp.lt.s32.totalorder %s147_s14, %s435_s26 }
  0x40   : > { %p432_p11 = pnand %p430_p1, %p386_p3  ;;  %p438_p7 = scmp.lt.s32.totalorder %s436_s27, %s429_s23 }
  0x42   : > { %p433_p12 = pneg %p432_p11  ;;  %p439_p2 = por %p438_p7, %p437_p6 }
  0x44   : > { %p440_p4 = pnand %p439_p2, %p433_p12 }
  0x46   : > { %443 = shalt.err (!%p440_p4)
}
  0x47   : > { %341 = dma.hbm_to_vmem [thread:$0]  (!%p608_p13), %s655_s7, 128, %s147_s14, %s136_s28  }
  0x48   : > { %p756_p10 = scmp.ne.s32.totalorder %s755_s29, 0 }
  0x49   : > { %s682_s5 = sand.u32 (!%p756_p10), 1, %s506_s10   ;;  %p757_p3 = scmp.ne.s32.totalorder (!%p756_p10), %s749_s20, 0 }
  0x4a   : > { %155 = sbr.rel (%p756_p10) target bundleno = 133 (0x85), region = 28  ;;  %s322_s6 = sshll.u32 (!%p756_p10), %s682_s5, 3 }
  0x4b   : > { %s158_s8 = scalar_lea.sflag (!%p756_p10), [#allocation3], %s682_s5  ;;  %s161_s30 = scalar_lea.vmem (!%p756_p10), [#allocation2], %s322_s6 }
  0x51   : > { %489 = dma.done.wait (%p757_p3), %s158_s8, 128  }
  0x52   : > { %491 = vsyncadd (%p757_p3), %s158_s8, 4294967168  ;;  %s167_s3 = scalar_lea.sflag [#allocation6], %s682_s5  ;;  %s170_s7 = scalar_lea.vmem [#allocation5], %s322_s6 }
  0x53   : > { %493 = dma.done.wait (%p757_p3), %s167_s3, 128  }
  0x54   : > { %495 = vsyncadd (%p757_p3), %s167_s3, 4294967168  ;;  %v197_v0 = vld [vmem:[%s170_s7] sm:$0xff]  ;;  %v196_v4 = vld [vmem:[%s161_s30] sm:$0xff]  ;;  %s195_s29 = scalar_lea.vmem [#allocation7], %s322_s6  ;;  %s326_s28 = sshll.u32 %s555_s13, 7 }
  0x55   : > { %v198_v1 = vmax.f32 %v197_v0, 1e-06  ;;  %s221_s14 = sshll.u32 %s195_s29, 4  ;;  %s701_s16 = scalar_lea.hbm %s745_s2, %s326_s28  ;;  %s696_s14 = int_to_ptr.vmem [resolvable:$true] %s221_s14 }
  0x56   : > { %s208_s24 = scalar_lea.sflag [#allocation4], %s682_s5  ;;  %s444_s17 = scalar_lea.vmem %s696_s14, 128 }
  0x57   : > { %v199_v2 = vmin.f32 %v198_v1, 1000000.0  ;;  %p445_p6 = scmp.ne.s32.totalorder %s696_s14, %s444_s17  ;;  %p758_p13 = scmp.ne.s32.totalorder %s750_s21, 0 }
  0x58   : > { %s518_s13 = smov [#allocation7]  }
  0x59   : > { %380 = vrcp.f32 %v199_v2  ;;  %p446_p7 = pnand %p445_p6, %p758_p13  ;;  %s448_s19 = sshll.u32 %s518_s13, 4  ;;  %s449_s19 = int_to_ptr.vmem [resolvable:$false] %s448_s19 }
  0x5a   : > { %s450_s23 = scalar_lea.vmem %s449_s19, 256  ;;  %p451_p8 = scmp.lt.s32.totalorder %s696_s14, %s449_s19 }
  0x5b   : > { %p447_p5 = pneg %p446_p7  ;;  %p452_p9 = scmp.lt.s32.totalorder %s450_s23, %s444_s17 }
  0x5d   : > { %p453_p0 = por %p452_p9, %p451_p8 }
  0x5f   : > { %p454_p1 = pnand %p453_p0, %p447_p5 }
  0x63   : > { %v381_v3 = vpop.eup %380 }
  0x64   : > { %v201_v5 = vmul.f32 0.70710677, %v381_v3 }
  0x66   : > { %v202_v6 = vmul.f32 %v201_v5, %v196_v4 }
  0x68   : > { %382 = verf.f32 %v202_v6 }
  0x72   : > { %v383_v7 = vpop.eup %382 }
  0x73   : > { %v204_v8 = vadd.f32 1.0, %v383_v7 }
  0x75   : > { %v205_v9 = vmul.f32 0.5, %v204_v8 }
  0x77   : > { %206 = vst [vmem:[%s195_s29] sm:$0xff] %v205_v9 }
  0x78   : > { %457 = shalt.err (!%p454_p1)
}
  0x79   : > { %s458_s25 = scalar_lea.hbm %s701_s16, 128  ;;  %s462_s5 = scalar_lea.hbm %s745_s2, 256 }
  0x7a   : > { %p459_p11 = scmp.ne.s32.totalorder %s701_s16, %s458_s25  ;;  %p463_p4 = scmp.lt.u32.totalorder %s701_s16, %s745_s2 }
  0x7b   : > { %p464_p10 = scmp.lt.u32.totalorder %s462_s5, %s458_s25  ;;  %p466_p6 = scmp.lt.u32.totalorder %s458_s25, %s701_s16 }
  0x7c   : > { %p460_p12 = pnand %p459_p11, %p758_p13 }
  0x7d   : > { %p465_p3 = por %p464_p10, %p463_p4 }
  0x7e   : > { %p461_p2 = pneg %p460_p12 }
  0x7f   : > { %p467_p7 = por %p466_p6, %p465_p3 }
  0x81   : > { %p468_p5 = pnand %p467_p7, %p461_p2 }
  0x83   : > { %471 = shalt.err (!%p468_p5)
}
  0x84   : > { %333 = dma.vmem_to_hbm [thread:$0]  (%p758_p13), %s696_s14, 128, %s701_s16, %s208_s24  }
  0x85 PF: > { %s233_s30 = sand.u32 1, %s502_s9   ;;  %p759_p8 = scmp.ne.s32.totalorder %s751_s22, 0 }
  0x86   : > { %p760_p9 = scmp.ge.s32.totalorder %s514_s12, 2  ;;  %s234_s3 = scalar_lea.sflag [#allocation4], %s233_s30 }
  0x88   : > { %p343_p0 = pnand %p760_p9, %p759_p8 }
  0x8a   : > { %497 = dma.done.wait (!%p343_p0), %s234_s3, 128  }
  0x8b   : > { %499 = vsyncadd (!%p343_p0), %s234_s3, 4294967168  ;;  %p18_p1 = scmp.ge.s32.totalorder %s559_s15, 4   ;;  %s761_s9 = smov %s506_s10 }
  0x8c   : > { %s762_s10 = smov %s510_s11  ;;  %s763_s11 = smov %s571_s18 }
  0x8d   : > { %s764_s12 = smov %s559_s15  ;;  %20 = sbr.rel (!%p18_p1) target bundleno = 7 (0x7), region = 86 }
  0x94   :  { %239 = vsyncpa [#allocation3], 1 }
  0x95   :  { %241 = vsyncpa [#allocation3 + $0x1], 1 }
  0x96   :  { %242 = vsyncpa [#allocation6], 1 }
  0x97   :  { %244 = vsyncpa [#allocation6 + $0x1], 1 }
  0x98   :  { %245 = vsyncpa [#allocation4], 1 }
  0x99   :  { %247 = vsyncpa [#allocation4 + $0x1], 1 }

</bundles_post_ra>
